<compile_context>
chip_gen: v7x
topology: tpu7x:2x2x1
jax: 0.10.0
libtpu: 0.0.40
codegen_flags: <defaults>
</compile_context>

<pallas_src>
import functools

import jax
import jax.numpy as jnp
from jax.experimental import pallas as pl
from jax.experimental.pallas import tpu as pltpu


_VMEM_BUDGET_BYTES = 26 * 1024 * 1024   # tile-selection budget (headroom under 32 MiB scoped)
_VMEM_LIMIT_BYTES = 32 * 1024 * 1024    # raise v5e's 16 MiB default; default on v6e/v7x


def _mlp_kernel(x_ref, w_ref, b_ref, o_ref, *, tn):
    # x_ref: (TB, H_in)      bf16 activation tile (resident across the N axis)
    # w_ref: (TN, H_in)      bf16 row-tile of the PyTorch [out, in] weight
    # b_ref: (1, H_out_pad)  f32 bias, resident (fetched once)
    # o_ref: (TB, TN)        output tile (features.dtype)
    j = pl.program_id(1)
    # Contract x axis 1 with w axis 1 -> (TB, TN). No transpose of W anywhere.
    y = jax.lax.dot_general(
        x_ref[...],
        w_ref[...],
        dimension_numbers=(((1,), (1,)), ((), ())),
        preferred_element_type=jnp.float32,
    )
    start = pl.multiple_of(j * tn, 128)
    b_tile = b_ref[:, pl.ds(start, tn)]
    # Fused f32 epilogue: bias add (VPU) + tanh (EUP slot), then cast out.
    o_ref[...] = jnp.tanh(y + b_tile).astype(o_ref.dtype)


def _vmem_working_set(tb, h_in, tn, h_out_pad, in_bytes, out_bytes):
    """Double-buffered VMEM working set for one grid step."""
    x_bytes = 2 * tb * h_in * in_bytes          # activation block (pipelined)
    w_bytes = 2 * tn * h_in * in_bytes          # weight row tile (pipelined)
    o_bytes = 2 * tb * tn * out_bytes           # output tile (pipelined)
    bias_bytes = 2 * h_out_pad * 4              # resident f32 bias
    return x_bytes + w_bytes + o_bytes + bias_bytes


def _pick_tile_n(h_out_pad, h_in, tb, in_bytes, out_bytes,
                 budget=_VMEM_BUDGET_BYTES):
    """Largest lane-dense (multiple-of-128) N tile that divides h_out_pad,
    fits the VMEM budget, and (when it doesn't force tiny tiles) keeps
    grid_n >= 2 so both v7x TensorCores get work."""
    max_tn = 1024 if h_in <= 2048 else 512
    cands = sorted(
        (c for c in range(128, h_out_pad + 1, 128) if h_out_pad % c == 0),
        reverse=True,
    )
    fitting = [
        c for c in cands
        if c <= max_tn
        and _vmem_working_set(tb, h_in, c, h_out_pad, in_bytes, out_bytes) <= budget
    ]
    if not fitting:
        fitting = [128]
    multi = [c for c in fitting if h_out_pad // c >= 2]
    if multi and (multi[0] >= 256 or h_out_pad <= 256):
        return multi[0]
    return fitting[0]


def mlp_layer(features, weight, bias, *, tn=None, tb=None,
              compute_dtype=jnp.bfloat16):
    """SimCSE MLPLayer forward: tanh(features @ weight.T + bias).

    features: [B, H_in]       (CLS representations)
    weight:   [H_out, H_in]   (PyTorch nn.Linear layout)
    bias:     [H_out]
    returns:  [B, H_out] in features.dtype

    Note: compute_dtype=jnp.bfloat16 casts activations/weights on the wire
    (halves weight HBM traffic); pass jnp.float32 for full f32 parity.
    """
    B, H_in = features.shape
    H_out, H_in_w = weight.shape
    assert H_in == H_in_w, "weight inner dim must match features"
    assert bias.shape == (H_out,)

    out_dtype = features.dtype
    in_bytes = jnp.dtype(compute_dtype).itemsize
    out_bytes = jnp.dtype(out_dtype).itemsize

    # ---- pad output features to a lane-dense multiple of 128 ----------------
    H_out_pad = pl.cdiv(H_out, 128) * 128

    x = features.astype(compute_dtype)
    w = weight.astype(compute_dtype)
    b = bias.astype(jnp.float32)
    if H_out_pad != H_out:
        w = jnp.pad(w, ((0, H_out_pad - H_out), (0, 0)))
        b = jnp.pad(b, (0, H_out_pad - H_out))
    b = b.reshape(1, H_out_pad)

    # ---- batch (M) tiling (only kicks in for large B) ------------------------
    if tb is None:
        tb = B
        if B > 512:
            for cand in (512, 256, 128):
                if B % cand == 0:
                    tb = cand
                    break
    assert B % tb == 0, "batch tile must divide the batch"
    grid_m = B // tb

    # ---- output-feature (N) tiling -------------------------------------------
    if tn is None:
        tn = _pick_tile_n(H_out_pad, H_in, tb, in_bytes, out_bytes)
    assert H_out_pad % tn == 0 and tn % 128 == 0, \
        "N tile must be a lane-dense divisor of the padded output width"
    grid_n = H_out_pad // tn

    cost = pl.CostEstimate(
        flops=2 * B * H_in * H_out_pad,
        transcendentals=B * H_out_pad,
        bytes_accessed=(H_out_pad * H_in * in_bytes
                        + B * H_in * in_bytes
                        + B * H_out_pad * out_bytes
                        + 4 * H_out_pad),
    )

    kernel = functools.partial(_mlp_kernel, tn=tn)

    out = pl.pallas_call(
        kernel,
        out_shape=jax.ShapeDtypeStruct((B, H_out_pad), out_dtype),
        grid_spec=pltpu.PrefetchScalarGridSpec(
            num_scalar_prefetch=0,
            grid=(grid_m, grid_n),
            in_specs=[
                pl.BlockSpec((tb, H_in), lambda i, j: (i, 0)),       # x row tile
                pl.BlockSpec((tn, H_in), lambda i, j: (j, 0)),       # W row tile
                pl.BlockSpec((1, H_out_pad), lambda i, j: (0, 0)),   # bias, resident
            ],
            out_specs=pl.BlockSpec((tb, tn), lambda i, j: (i, j)),
        ),
        compiler_params=pltpu.CompilerParams(
            # Both axes are independent -> shard across TensorCores on v7x.
            dimension_semantics=("parallel", "parallel"),
            vmem_limit_bytes=_VMEM_LIMIT_BYTES,
        ),
        cost_estimate=cost,
    )(x, w, b)

    if H_out_pad != H_out:
        out = out[:, :H_out]
    return out


if __name__ == "__main__":
    key = jax.random.PRNGKey(0)

    def run_case(batch, hidden, tn=None):
        k_x, k_w, k_b = jax.random.split(jax.random.fold_in(key, hidden), 3)
        x = jax.random.normal(k_x, (batch, hidden), dtype=jnp.float32)
        # Deterministic synthetic parameters (not a checkpoint load).
        w = jax.random.normal(k_w, (hidden, hidden), dtype=jnp.float32) * 0.02
        b = jax.random.normal(k_b, (hidden,), dtype=jnp.float32) * 0.02

        out = mlp_layer(x, w, b, tn=tn)
        jax.block_until_ready(out)
        assert out.shape == (batch, hidden)

        # (1) Tight check against the same bf16-input math (validates the kernel:
        #     bf16 MXU matmul w/ f32 accumulation, f32 bias + tanh).
        xw_bf16 = (x.astype(jnp.bfloat16).astype(jnp.float32)
                   @ w.astype(jnp.bfloat16).astype(jnp.float32).T)
        ref_bf16 = jnp.tanh(xw_bf16 + b)
        assert jnp.allclose(out, ref_bf16, atol=1e-3, rtol=1e-3)

        # (2) Loose check against the full-f32 PyTorch Linear+Tanh semantics
        #     (the bf16 weight/activation cast is the only source of difference).
        ref_f32 = jnp.tanh(x @ w.T + b)
        assert jnp.allclose(out, ref_f32, atol=2e-2, rtol=2e-2)

    # Lane-dense case: hidden=256 -> tn=128, grid=(1, 2): exercises N-tiling,
    # the pipelined weight path, and the two-TensorCore "parallel" split.
    run_case(8, 256)
    # Non-128-aligned hidden: padded to 256 in the wrapper, tiled lane-dense
    # path, output sliced back to 200 — no masked stores, no grid=1 fallback.
    run_case(8, 200)

    print("KERNEL_OK")
</pallas_src>

<mosaic_0001>
module attributes {stable_mosaic.version = 11 : i64} {
  func.func @_mlp_kernel(%arg0: i32, %arg1: i32, %arg2: memref<8x256xbf16, #tpu.memory_space<vmem>>, %arg3: memref<128x256xbf16, #tpu.memory_space<vmem>>, %arg4: memref<1x256xf32, #tpu.memory_space<vmem>>, %arg5: memref<8x128xf32, #tpu.memory_space<vmem>>) attributes {dimension_semantics = [#tpu.dimension_semantics<parallel>, #tpu.dimension_semantics<parallel>], iteration_bounds = array<i64: 1, 2>, scalar_prefetch = 0 : i64, scratch_operands = 0 : i64, tpu.core_type = #tpu.core_type<tc>, window_params = [{transform_indices = @transform_0, window_bounds = array<i64: 8, 256>}, {transform_indices = @transform_1, window_bounds = array<i64: 128, 256>}, {pipeline_mode = #tpu.pipeline_mode<synchronous>, transform_indices = @transform_2, window_bounds = array<i64: 1, 256>}, {transform_indices = @transform_3, window_bounds = array<i64: 8, 128>}]} {
    %c0 = arith.constant 0 : index
    %c0_0 = arith.constant 0 : index
    %0 = vector.load %arg2[%c0, %c0_0] : memref<8x256xbf16, #tpu.memory_space<vmem>>, vector<8x256xbf16>
    %c0_1 = arith.constant 0 : index
    %c0_2 = arith.constant 0 : index
    %1 = vector.load %arg3[%c0_1, %c0_2] : memref<128x256xbf16, #tpu.memory_space<vmem>>, vector<128x256xbf16>
    %cst = arith.constant dense<0.000000e+00> : vector<8x128xf32>
    %2 = tpu.matmul %0, %1, %cst {dimension_numbers = #tpu.dot_dimension_numbers<[1], [1], [0], [0], [0, 0, 1, 0], [], []>} : vector<8x256xbf16>, vector<128x256xbf16>, vector<8x128xf32> -> vector<8x128xf32>
    %c128_i32 = arith.constant 128 : i32
    %3 = arith.muli %arg1, %c128_i32 : i32
    %4 = tpu.assume_multiple %3, 128 : i32
    %c0_3 = arith.constant 0 : index
    %5 = arith.index_cast %4 : i32 to index
    %6 = vector.load %arg4[%c0_3, %5] : memref<1x256xf32, #tpu.memory_space<vmem>>, vector<1x128xf32>
    %7 = vector.broadcast %6 : vector<1x128xf32> to vector<8x128xf32>
    %8 = arith.addf %2, %7 : vector<8x128xf32>
    %9 = math.tanh %8 : vector<8x128xf32>
    %c0_4 = arith.constant 0 : index
    %c0_5 = arith.constant 0 : index
    %10 = vector.load %arg5[%c0_4, %c0_5] : memref<8x128xf32, #tpu.memory_space<vmem>>, vector<8x128xf32>
    tpu.vector_store %arg5[%c0_4, %c0_5], %9 {strides = array<i32>} : memref<8x128xf32, #tpu.memory_space<vmem>>, vector<8x128xf32>,
    return
  }
  func.func @transform_0(%arg0: i32, %arg1: i32) -> (i32, i32) {
    %c0_i32 = arith.constant 0 : i32
    %c0_i32_0 = arith.constant 0 : i32
    return %arg0, %c0_i32 : i32, i32
  }
  func.func @transform_1(%arg0: i32, %arg1: i32) -> (i32, i32) {
    %c0_i32 = arith.constant 0 : i32
    %c0_i32_0 = arith.constant 0 : i32
    return %arg1, %c0_i32 : i32, i32
  }
  func.func @transform_2(%arg0: i32, %arg1: i32) -> (i32, i32) {
    %c0_i32 = arith.constant 0 : i32
    %c0_i32_0 = arith.constant 0 : i32
    %c0_i32_1 = arith.constant 0 : i32
    return %c0_i32, %c0_i32_0 : i32, i32
  }
  func.func @transform_3(%arg0: i32, %arg1: i32) -> (i32, i32) {
    %c0_i32 = arith.constant 0 : i32
    return %arg0, %arg1 : i32, i32
  }
}

</mosaic_0001>

<bundles_post_ra>
// kernel: tpu_custom_call.1
= control target key start
LH: loop header
LB: loop body
LE: loop exit
PB: predicated region body
PF: predicated region fallthrough
CT: control target
= control target key end

     0   :  { %8 = vsyncpa [#allocation3], 0  ;;  %s1049_s0 = inlined_call_operand.hbm [shape: bf16[8,256], index: 0, kind: input, shape index: {}]   ;;  %s1050_s1 = inlined_call_operand.hbm [shape: bf16[256,256], index: 1, kind: input, shape index: {}]   ;;  %s1051_s2 = inlined_call_operand.vmem [shape: f32[1,256], index: 2, kind: input, shape index: {}]   ;;  %s1052_s3 = inlined_call_operand.hbm [shape: f32[8,256], index: 3, kind: output, shape index: {}]  }
   0x1   :  { %9 = vsyncpa [#allocation6], 0 }
   0x2   :  { %11 = vsyncpa [#allocation6 + $0x1], 0 }
   0x3   :  { %12 = vsyncpa [#allocation4], 0 }
   0x4   :  { %14 = vsyncpa [#allocation4 + $0x1], 0  ;;  %s808_s12 = smov 0   ;;  %s810_s13 = smov 0  }
   0x5   :  { %s812_s14 = smov 0   ;;  %s814_s15 = smov 0  }
   0x6   :  { %s816_s16 = smov 0   ;;  %s818_s17 = smov 0  }
   0x7 LB: > { %s495_s18 = sadd.s32 4294967295, %s781_s17   ;;  %s496_s19 = sadd.s32 4294967294, %s781_s17   ;;  %s781_s17 = sphi %s818_s17, %s20_s17   ;;  %s777_s16 = sphi %s816_s16, %s1080_s16   ;;  %s773_s15 = sphi %s814_s15, %s1079_s15   ;;  %s769_s14 = sphi %s812_s14, %s1078_s14   ;;  %s765_s13 = sphi %s810_s13, %s1077_s13   ;;  %s761_s12 = sphi %s808_s12, %s1076_s12  }
   0x8   : > { %s65_s20 = sadd.s32 1, %s769_s14  ;;  %p72_p0 = scmp.ne.s32.totalorder %s769_s14, %s765_s13 }
   0x9   : > { %p73_p1 = scmp.eq.s32.totalorder %s781_s17, 0  ;;  %p78_p2 = scmp.ne.s32.totalorder %s765_s13, %s761_s12 }
   0xa   : > { %p846_p3 = scmp.eq.s32.totalorder %s495_s18, 0  ;;  %p125_p4 = scmp.eq.s32.totalorder %s495_s18, 1 }
   0xb   : > { %p850_p5 = por %p73_p1, %p72_p0  ;;  %p131_p6 = scmp.eq.s32.totalorder %s496_s19, 1 }
   0xc   : > { %s1059_s21 = scalar_select %p846_p3, 1, 0 }
   0xd   : > { %p856_p7 = por %p846_p3, %p78_p2  ;;  %p860_p8 = por %p125_p4, %p72_p0 }
   0xe   : > { %p864_p9 = por %p131_p6, %p78_p2  ;;  %p497_p10 = scmp.ge.s32.totalorder %s781_s17, 1 }
   0xf   : > { %s1061_s23 = scalar_select %p856_p7, 1, 0 }
  0x10   : > { %s1062_s24 = scalar_select %p860_p8, 1, 0 }
  0x11   : > { %s1063_s25 = scalar_select %p864_p9, 1, 0 }
  0x12   : > { %p138_p11 = scmp.lt.s32.totalorder %s781_s17, 3  ;;  %s783_s27 = smov [#allocation2]  }
  0x13   : > { %s154_s28 = sshll.u32 %s783_s27, 4  ;;  %p555_p1 = scmp.lt.s32.totalorder %s781_s17, 2  ;;  %s155_s28 = int_to_ptr.vmem [resolvable:$true] %s154_s28 }
  0x14   : > { %p871_p13 = pnand %p497_p10, %p138_p11  ;;  %s29_s4 = sadd.s32 1, %s777_s16 }
  0x15   : > { %p880_p4 = pnand %p555_p1, %p850_p5  ;;  %p891_p6 = scmp.ge.s32.totalorder %s29_s4, 2 }
  0x16   : > { %s1064_s26 = scalar_select %p871_p13, 1, 0 }
  0x17   : > { %p542_p0 = pneg %p871_p13  ;;  %s168_s6 = sand.u32 1, %s769_s14  }
  0x18   : > { %s1065_s29 = scalar_select %p880_p4, 1, 0 }
  0x19   : > { %p886_p2 = pnand %p542_p0, %p846_p3  ;;  %s637_s9 = scalar_lea.hbm %s1049_s0, 128 }
  0x1a   : > { %s1067_s5 = scalar_select %p891_p6, 1, 0 }
  0x1b   : > { %p638_p5 = scmp.ne.s32.totalorder %s1049_s0, %s637_s9  ;;  %p639_p10 = pneg %p886_p2 }
  0x1c   : > { %p644_p0 = scmp.lt.u32.totalorder %s637_s9, %s1049_s0 }
  0x1d   : > { %p640_p11 = pnand %p639_p10, %p638_p5 }
  0x1f   : > { %p641_p1 = pneg %p640_p11 }
  0x21   : > { %p646_p12 = pnand %p644_p0, %p641_p1 }
  0x23   : > { %649 = shalt.err (!%p646_p12)
}
  0x24   : > { %s650_s22 = scalar_lea.vmem %s155_s28, 128  ;;  %p658_p3 = scmp.lt.s32.totalorder %s155_s28, %s155_s28 }
  0x25   : > { %p651_p9 = scmp.ne.s32.totalorder %s155_s28, %s650_s22  ;;  %p659_p13 = scmp.lt.s32.totalorder %s650_s22, %s650_s22 }
  0x27   : > { %p653_p8 = pnand %p651_p9, %p639_p10  ;;  %p660_p4 = por %p659_p13, %p658_p3 }
  0x29   : > { %p654_p7 = pneg %p653_p8 }
  0x2b   : > { %p661_p6 = pnand %p660_p4, %p654_p7 }
  0x2d   : > { %664 = shalt.err (!%p661_p6)
}
  0x2e   : > { %545 = dma.hbm_to_vmem [thread:$0]  (!%p886_p2), %s1049_s0, 128, %s155_s28, [#allocation3]  }
  0x2f   : > { %p1068_p9 = scmp.ne.s32.totalorder %s1067_s5, 0  ;;  %s500_s8 = sshll.u32 %s168_s6, 7 }
  0x30   : > { %s533_s10 = sshll.u32 %s777_s16, 11  ;;  %s172_s19 = scalar_lea.vmem [#allocation5], %s500_s8 }
  0x31   : > { %s1082_s4 = smov (%p1068_p9, %s29_s4), 0  ;;  %s922_s18 = scalar_lea.hbm %s1050_s1, %s533_s10 }
  0x32   : > { %s62_s9 = ssub.s32 %s777_s16, %s1082_s4  ;;  %s180_s22 = sshll.u32 %s172_s19, 4  ;;  %s929_s22 = int_to_ptr.vmem [resolvable:$true] %s180_s22 }
  0x33   : > { %p63_p3 = scmp.eq.s32.totalorder %s62_s9, 0  ;;  %s931_s5 = scalar_lea.sflag [#allocation6], %s168_s6 }
  0x34   : > { %s665_s27 = scalar_lea.hbm %s922_s18, 2048  ;;  %p1069_p8 = scmp.ne.s32.totalorder %s1065_s29, 0 }
  0x35   : > { %s927_s28 = scalar_select %p63_p3, %s769_s14, %s65_s20  }
  0x36   : > { %p666_p7 = scmp.ne.s32.totalorder %s922_s18, %s665_s27  ;;  %p667_p12 = pneg %p1069_p8 }
  0x37   : > { %s670_s8 = scalar_lea.hbm %s1050_s1, 4096  ;;  %p671_p2 = scmp.lt.u32.totalorder %s922_s18, %s1050_s1 }
  0x38   : > { %p668_p13 = pnand %p667_p12, %p666_p7  ;;  %p672_p6 = scmp.lt.u32.totalorder %s670_s8, %s665_s27 }
  0x39   : > { %p674_p10 = scmp.lt.u32.totalorder %s665_s27, %s922_s18 }
  0x3a   : > { %p669_p4 = pneg %p668_p13  ;;  %p673_p5 = por %p672_p6, %p671_p2 }
  0x3c   : > { %p675_p11 = por %p674_p10, %p673_p5 }
  0x3e   : > { %p676_p1 = pnand %p675_p11, %p669_p4 }
  0x40   : > { %679 = shalt.err (!%p676_p1)
}
  0x41   : > { %s680_s20 = scalar_lea.vmem %s929_s22, 2048  ;;  %s784_s6 = smov [#allocation5]  }
  0x42   : > { %p681_p0 = scmp.ne.s32.totalorder %s929_s22, %s680_s20  ;;  %s685_s11 = sshll.u32 %s784_s6, 4  ;;  %s686_s11 = int_to_ptr.vmem [resolvable:$false] %s685_s11 }
  0x43   : > { %s687_s19 = scalar_lea.vmem %s686_s11, 4096  ;;  %p688_p7 = scmp.lt.s32.totalorder %s929_s22, %s686_s11 }
  0x44   : > { %p683_p9 = pnand %p681_p0, %p667_p12  ;;  %p689_p13 = scmp.lt.s32.totalorder %s687_s19, %s680_s20 }
  0x46   : > { %p684_p3 = pneg %p683_p9  ;;  %p690_p2 = por %p689_p13, %p688_p7 }
  0x48   : > { %p691_p6 = pnand %p690_p2, %p684_p3 }
  0x4a   : > { %694 = shalt.err (!%p691_p6)
}
  0x4b   : > { %s785_s27 = smov 128   ;;  %s786_s7 = smov 8  }
  0x4c   : > { %549 = dma.hbm_to_vmem [thread:$0]  (!%p1069_p8), %s922_s18, 2048, %s929_s22, %s931_s5, %s785_s27, %s785_s27, %s786_s7  }
  0x4d   : > { %p1070_p12 = scmp.ne.s32.totalorder %s1064_s26, 0 }
  0x4e   : > { %p1071_p4 = scmp.ne.s32.totalorder (!%p1070_p12), %s1059_s21, 0 }
  0x4f   : > { %192 = sbr.rel (%p1070_p12) target bundleno = 395 (0x18b), region = 32 }
  0x56   : > { %748 = dma.done.wait (%p1071_p4), [#allocation3], 128  }
  0x57   : > { %750 = vsyncadd (%p1071_p4), [#allocation3], 4294967168  ;;  %s966_s9 = sand.u32 1, %s765_s13   ;;  %p1072_p8 = scmp.ne.s32.totalorder %s1061_s23, 0 }
  0x58   : > { %s506_s8 = sshll.u32 %s966_s9, 7  ;;  %s199_s10 = scalar_lea.sflag [#allocation6], %s966_s9 }
  0x59   : > { %s970_s30 = scalar_lea.vmem [#allocation5], %s506_s8 }
  0x5a   : > { %752 = dma.done.wait (%p1072_p8), %s199_s10, 2048  }
  0x5b   : > { %754 = vsyncadd (%p1072_p8), %s199_s10, 4294965248  ;;  %v609_v0 = vld [vmem:[%s970_s30 + $0x4] ss:$8 sps:$4 sm:$0xff]   ;;  %v611_v1 = vld [vmem:[%s970_s30] ss:$8 sps:$4 sm:$0xff]   ;;  %s508_s21 = sshll.u32 %s773_s15, 7 }
  0x5c   : > { %342 = vmatprep.subr.bf16.mxu0 %v609_v0  ;;  %v612_v2 = vld [vmem:[%s970_s30 + $0x14] ss:$8 sps:$4 sm:$0xff]   ;;  %v614_v3 = vld [vmem:[%s970_s30 + $0x10] ss:$8 sps:$4 sm:$0xff]   ;;  %v615_v4 = vld [vmem:[%s970_s30 + $0x24] ss:$8 sps:$4 sm:$0xff]   ;;  %s1000_s15 = scalar_lea.hbm %s1052_s3, %s508_s21 }
  0x5d   : > { %343 = vmatpush1.bf16.xpose.msra.mxu0 %v611_v1  ;;  %v227_v5 = vld [vmem:[#allocation2] sm:$0xff]  ;;  %v617_v7 = vld [vmem:[%s970_s30 + $0x20] ss:$8 sps:$4 sm:$0xff]   ;;  %v621_v10 = vld [vmem:[%s970_s30 + $0x44] ss:$8 sps:$4 sm:$0xff]   ;;  %s245_s23 = sshra.s32 %s508_s21, 7 }
  0x5e   : > { %344 = vmatprep.subr.bf16.mxu0 %v612_v2  ;;  %v511_v6 = vcombine.high %v227_v5, %v227_v5  ;;  %v618_v8 = vld [vmem:[%s970_s30 + $0x34] ss:$8 sps:$4 sm:$0xff]   ;;  %v620_v9 = vld [vmem:[%s970_s30 + $0x30] ss:$8 sps:$4 sm:$0xff]   ;;  %v623_v11 = vld [vmem:[%s970_s30 + $0x40] ss:$8 sps:$4 sm:$0xff]   ;;  %v510_v18 = vcombine.low %v227_v5, %v227_v5  ;;  %s247_s18 = scalar_lea.vmem %s1051_s2, %s245_s23 }
  0x5f   : > { %v624_v12 = vld [vmem:[%s970_s30 + $0x54] ss:$8 sps:$4 sm:$0xff]   ;;  %v626_v13 = vld [vmem:[%s970_s30 + $0x50] ss:$8 sps:$4 sm:$0xff]   ;;  %v627_v14 = vld [vmem:[%s970_s30 + $0x64] ss:$8 sps:$4 sm:$0xff]  }
  0x60   : > { %374 = vmatprep.mubr.bf16.mxu0 %v511_v6  ;;  %v629_v15 = vld [vmem:[%s970_s30 + $0x60] ss:$8 sps:$4 sm:$0xff]   ;;  %v630_v16 = vld [vmem:[%s970_s30 + $0x74] ss:$8 sps:$4 sm:$0xff]   ;;  %v632_v17 = vld [vmem:[%s970_s30 + $0x70] ss:$8 sps:$4 sm:$0xff]  }
  0x61   : > { %v509_v19 = vld [vmem:[%s247_s18] ss:$0 sm:$0xff]  ;;  %s507_s22 = sshll.u32 %s966_s9, 3  ;;  %s385_s19 = scalar_lea.sflag [#allocation4], %s966_s9 }
  0x62   : > { %s224_s5 = scalar_lea.vmem [#allocation7], %s507_s22  ;;  %p1073_p10 = scmp.ne.s32.totalorder %s1062_s24, 0 }
  0x63   : > { %s400_s20 = sshll.u32 %s224_s5, 4  ;;  %s787_s7 = smov [#allocation7]   ;;  %s1002_s20 = int_to_ptr.vmem [resolvable:$true] %s400_s20 }
  0x64   : > { %s695_s27 = scalar_lea.vmem %s1002_s20, 128  ;;  %s699_s8 = sshll.u32 %s787_s7, 4  ;;  %s700_s8 = int_to_ptr.vmem [resolvable:$false] %s699_s8 }
  0x65   : > { %345 = vmatpush1.bf16.xpose.msra.mxu0 %v614_v3  ;;  %p696_p5 = scmp.ne.s32.totalorder %s1002_s20, %s695_s27  ;;  %s701_s10 = scalar_lea.vmem %s700_s8, 256 }
  0x66   : > { %346 = vmatprep.subr.bf16.mxu0 %v615_v4  ;;  %p702_p0 = scmp.lt.s32.totalorder %s1002_s20, %s700_s8  ;;  %p703_p9 = scmp.lt.s32.totalorder %s701_s10, %s695_s27 }
  0x67   : > { %p697_p11 = pnand %p696_p5, %p1073_p10 }
  0x68   : > { %p704_p3 = por %p703_p9, %p702_p0 }
  0x69   : > { %p698_p1 = pneg %p697_p11 }
  0x6b   : > { %p705_p7 = pnand %p704_p3, %p698_p1 }
  0x6d   : > { %347 = vmatpush1.bf16.xpose.msra.mxu0 %v617_v7 }
  0x6e   : > { %348 = vmatprep.subr.bf16.mxu0 %v618_v8 }
  0x75   : > { %349 = vmatpush1.bf16.xpose.msra.mxu0 %v620_v9 }
  0x76   : > { %350 = vmatprep.subr.bf16.mxu0 %v621_v10 }
  0x7d   : > { %351 = vmatpush1.bf16.xpose.msra.mxu0 %v623_v11 }
  0x7e   : > { %352 = vmatprep.subr.bf16.mxu0 %v624_v12 }
  0x85   : > { %353 = vmatpush1.bf16.xpose.msra.mxu0 %v626_v13 }
  0x86   : > { %354 = vmatprep.subr.bf16.mxu0 %v627_v14 }
  0x8d   : > { %355 = vmatpush1.bf16.xpose.msra.mxu0 %v629_v15 }
  0x8e   : > { %356 = vmatprep.subr.bf16.mxu0 %v630_v16 }
  0x95   : > { %357 = vmatpush1.bf16.xpose.msra.mxu0 %v632_v17 }
  0x9c   : > { %375 = vmatmul.mubr.bf16.vlgmr.msra.gmra.mrb[0].mxu0 %v510_v18 }
 0x16f   : > { %v376_v20 = vpop.f32.mrb[0].mxu0 }
 0x170   : > { %v377_v21 = vadd.f32 %v509_v19, %v376_v20  ;;  %v378_v22 = vpop.f32.mrb[1].mxu0 }
 0x171   : > { %v379_v23 = vpop.f32.mrb[2].mxu0 }
 0x172   : > { %635 = vtanh.f32 %v377_v21  ;;  %v380_v24 = vpop.f32.mrb[3].mxu0 }
 0x17c   : > { %v636_v25 = vpop.eup %635 }
 0x17d   : > { %383 = vst [vmem:[%s224_s5] sm:$0xff] %v636_v25 }
 0x17e   : > { %708 = shalt.err (!%p705_p7)
}
 0x17f   : > { %s709_s9 = scalar_lea.hbm %s1000_s15, 128  ;;  %s713_s23 = scalar_lea.hbm %s1052_s3, 256 }
 0x180   : > { %p710_p13 = scmp.ne.s32.totalorder %s1000_s15, %s709_s9  ;;  %p714_p12 = scmp.lt.u32.totalorder %s1000_s15, %s1052_s3 }
 0x181   : > { %p715_p4 = scmp.lt.u32.totalorder %s713_s23, %s709_s9  ;;  %p717_p5 = scmp.lt.u32.totalorder %s709_s9, %s1000_s15 }
 0x182   : > { %p711_p2 = pnand %p710_p13, %p1073_p10 }
 0x183   : > { %p716_p8 = por %p715_p4, %p714_p12 }
 0x184   : > { %p712_p6 = pneg %p711_p2 }
 0x185   : > { %p718_p11 = por %p717_p5, %p716_p8 }
 0x187   : > { %p719_p1 = pnand %p718_p11, %p712_p6 }
 0x189   : > { %722 = shalt.err (!%p719_p1)
}
 0x18a   : > { %540 = dma.vmem_to_hbm [thread:$0]  (%p1073_p10), %s1002_s20, 128, %s1000_s15, %s385_s19  }
 0x18b PF: > { %s412_s18 = sand.u32 1, %s761_s12   ;;  %p1074_p0 = scmp.ne.s32.totalorder %s1063_s25, 0 }
 0x18c   : > { %p1075_p9 = scmp.ge.s32.totalorder %s781_s17, 2  ;;  %s413_s22 = scalar_lea.sflag [#allocation4], %s412_s18 }
 0x18e   : > { %p551_p3 = pnand %p1075_p9, %p1074_p0 }
 0x190   : > { %756 = dma.done.wait (!%p551_p3), %s413_s22, 128  }
 0x191   : > { %758 = vsyncadd (!%p551_p3), %s413_s22, 4294967168  ;;  %s20_s17 = sadd.s32 1, %s781_s17   ;;  %s1076_s12 = smov %s765_s13 }
 0x192   : > { %p17_p7 = scmp.ge.s32.totalorder %s20_s17, 4   ;;  %s1077_s13 = smov %s769_s14 }
 0x193   : > { %s1078_s14 = smov %s927_s28  ;;  %s1079_s15 = smov %s777_s16 }
 0x194   : > { %s1080_s16 = smov %s1082_s4  ;;  %19 = sbr.rel (!%p17_p7) target bundleno = 7 (0x7), region = 84 }
 0x19b   :  { %418 = vsyncpa [#allocation3], 1 }
 0x19c   :  { %420 = vsyncpa [#allocation3 + $0x1], 1 }
 0x19d   :  { %421 = vsyncpa [#allocation6], 1 }
 0x19e   :  { %423 = vsyncpa [#allocation6 + $0x1], 1 }
 0x19f   :  { %424 = vsyncpa [#allocation4], 1 }
 0x1a0   :  { %426 = vsyncpa [#allocation4 + $0x1], 1 }

</bundles_post_ra>
